<compile_context>
chip_gen: v7x
topology: tpu7x:2x2x1
jax: 0.10.0
libtpu: 0.0.40
codegen_flags: <defaults>
</compile_context>

<pallas_src>
import functools
import math

import jax
import jax.numpy as jnp
from jax.experimental import pallas as pl
from jax.experimental.pallas import tpu as pltpu

N_FREQS = 16
_C = 2 * N_FREQS  # 32 features per row in the original layout


def _annealed_mul_kernel(w_ref, x_ref, o_ref):
    # w_ref: (1, L) f32 weight row (resident, same block index every grid step)
    # x_ref / o_ref: (TR, L) data tiles.  Multiply in f32, cast only on store.
    o_ref[...] = (x_ref[...] * w_ref[...]).astype(o_ref.dtype)


def _annealing_weights(step, annealed_step, annealed_begin_step):
    """Traced-step (jit-stable) weight vector, f32, shape (32,)."""
    step = jnp.asarray(step, jnp.float32)
    n = jnp.float32(N_FREQS)
    if annealed_begin_step == 0:  # static config branch (matches PyTorch)
        alpha = n * step / jnp.float32(annealed_step)
    else:
        alpha = jnp.where(
            step <= jnp.float32(annealed_begin_step),
            jnp.float32(0.0),
            n * (step - jnp.float32(annealed_begin_step)) / jnp.float32(annealed_step),
        )
    # index_2 = [0,0,1,1,...,15,15]  (== linspace(0,15,16).view(-1,1).repeat(1,2).view(-1))
    index_2 = jnp.repeat(jnp.arange(N_FREQS, dtype=jnp.float32), 2)
    return (1.0 - jnp.cos(math.pi * jnp.clip(alpha - index_2, 0.0, 1.0))) * 0.5


def _target_block_bytes():
    # ~4 MiB blocks on v7x (64 MiB VMEM part, 3.2 TB/s -> need big blocks to amortize
    # the ~0.35us per-grid-step overhead); ~2 MiB on v5e/v6e (respects 16/32 MiB
    # scoped-VMEM defaults with input+output double-buffering).
    try:
        vmem = pltpu.get_tpu_info().vmem_capacity_bytes
        return (4 << 20) if vmem <= (64 << 20) else (2 << 20)
    except Exception:
        return 2 << 20


def annealed_hash(x_embed, step, *, annealed_step, annealed_begin_step=0,
                  min_pallas_bytes=(2 << 20), tile_rows=None):
    """x_embed: (B, 32); step: traced or Python scalar.  Returns (B, 32)."""
    B, C = x_embed.shape
    assert C == _C, f"expected last dim {_C}, got {C}"

    w = _annealing_weights(step, annealed_step, annealed_begin_step)  # f32 (32,)

    itemsize = jnp.dtype(x_embed.dtype).itemsize
    total = B * C
    sub = max(8, 32 // itemsize)  # min sublane tile: 8 f32 / 16 bf16 / 32 int8

    # Fast path: tiny inputs, or shapes that cannot be viewed lane-dense without
    # padding (B*32 not a multiple of 128).  A fused XLA multiply beats a
    # pallas_call launch here and avoids any extra pad/crop HBM traffic.
    if (total % 128 != 0) or (total * itemsize < min_pallas_bytes):
        return (x_embed * w).astype(x_embed.dtype)

    # Lane-dense view: widest lane width (multiple of 128 and of 32) that divides
    # B*32 exactly -> no padding, no cropping; the reshape is a pure bitcast and
    # every row starts at feature 0, so the tiled weight row stays aligned.
    lane_width = next(lw for lw in (1024, 512, 256, 128) if total % lw == 0)
    rows = total // lane_width
    if rows < sub:
        return (x_embed * w).astype(x_embed.dtype)

    row_bytes = lane_width * itemsize
    tr = tile_rows if tile_rows is not None else max(1, _target_block_bytes() // row_bytes)
    tr = max(sub, (min(tr, rows) // sub) * sub)  # multiple of sublane tile, <= rows

    w_row = jnp.tile(w, lane_width // C).reshape(1, lane_width)  # f32, row-periodic
    x2d = x_embed.reshape(rows, lane_width)

    grid = (pl.cdiv(rows, tr),)  # ragged last block handled by Pallas masking
    out2d = pl.pallas_call(
        _annealed_mul_kernel,
        out_shape=jax.ShapeDtypeStruct((rows, lane_width), x_embed.dtype),
        grid=grid,
        in_specs=[
            pl.BlockSpec((1, lane_width), lambda i: (0, 0)),    # resident weight row
            pl.BlockSpec((tr, lane_width), lambda i: (i, 0)),   # streaming data tile
        ],
        out_specs=pl.BlockSpec((tr, lane_width), lambda i: (i, 0)),
        compiler_params=pltpu.CompilerParams(
            # TODO(synk): confirm "parallel" shards the row axis across both v7x
            # TensorCores; switch to pltpu.CORE_PARALLEL if it does not.
            dimension_semantics=("parallel",),
        ),
        cost_estimate=pl.CostEstimate(
            flops=total,
            transcendentals=0,
            bytes_accessed=2 * total * itemsize + lane_width * 4,
        ),
    )(w_row, x2d)

    return out2d.reshape(B, C)


def _reference(x_embed, step, *, annealed_step, annealed_begin_step=0):
    # Pure-JAX reference mirroring the PyTorch forward (Python branching on step).
    index_2 = jnp.repeat(jnp.arange(N_FREQS, dtype=jnp.float32), 2)
    if annealed_begin_step == 0:
        alpha = N_FREQS * step / float(annealed_step)
    elif step <= annealed_begin_step:
        alpha = 0.0
    else:
        alpha = N_FREQS * (step - annealed_begin_step) / float(annealed_step)
    w = (1.0 - jnp.cos(math.pi * jnp.clip(alpha - index_2, 0.0, 1.0))) / 2.0
    return x_embed * w


if __name__ == "__main__":
    C = 2 * N_FREQS  # 32
    annealed_step = 4000

    # ---- Small input (B=8): exercises the XLA fast path, all three step branches.
    x_small = jax.random.normal(jax.random.PRNGKey(0), (8, C), dtype=jnp.float32)
    for step, begin in [(2500.0, 1000), (1234.0, 0), (500.0, 1000)]:
        out = jax.block_until_ready(
            annealed_hash(x_small, step, annealed_step=annealed_step,
                          annealed_begin_step=begin))
        ref = _reference(x_small, step, annealed_step=annealed_step,
                         annealed_begin_step=begin)
        assert out.shape == (8, C) and out.dtype == x_small.dtype
        assert jnp.allclose(out, ref, atol=1e-5, rtol=1e-5), f"mismatch small {step},{begin}"

    # ---- Pallas path (forced): B=1000 -> total=32000, lane_width=256, rows=125,
    # tile_rows=16 -> 8 grid steps with a ragged last block.  Jitted once, reused
    # across traced step values (no per-step recompilation).
    x_big = jax.random.normal(jax.random.PRNGKey(0), (1000, C), dtype=jnp.float32)
    run = jax.jit(functools.partial(
        annealed_hash, annealed_step=annealed_step, annealed_begin_step=1000,
        min_pallas_bytes=0, tile_rows=16))
    for step in (2500.0, 3000.0, 500.0):
        out = jax.block_until_ready(run(x_big, jnp.float32(step)))
        ref = _reference(x_big, step, annealed_step=annealed_step,
                         annealed_begin_step=1000)
        assert out.shape == (1000, C) and out.dtype == x_big.dtype
        assert jnp.allclose(out, ref, atol=1e-5, rtol=1e-5), f"mismatch pallas {step}"

    print("KERNEL_OK")
</pallas_src>

<mosaic_0001>
module attributes {stable_mosaic.version = 11 : i64} {
  func.func @_annealed_mul_kernel(%arg0: i32, %arg1: memref<1x256xf32, #tpu.memory_space<vmem>>, %arg2: memref<16x256xf32, #tpu.memory_space<vmem>>, %arg3: memref<16x256xf32, #tpu.memory_space<vmem>>) attributes {dimension_semantics = [#tpu.dimension_semantics<parallel>], iteration_bounds = array<i64: 8>, scalar_prefetch = 0 : i64, scratch_operands = 0 : i64, tpu.core_type = #tpu.core_type<tc>, window_params = [{pipeline_mode = #tpu.pipeline_mode<synchronous>, transform_indices = @transform_0, window_bounds = array<i64: 1, 256>}, {transform_indices = @transform_1, window_bounds = array<i64: 16, 256>}, {transform_indices = @transform_2, window_bounds = array<i64: 16, 256>}]} {
    %c0 = arith.constant 0 : index
    %c0_0 = arith.constant 0 : index
    %0 = vector.load %arg2[%c0, %c0_0] : memref<16x256xf32, #tpu.memory_space<vmem>>, vector<16x256xf32>
    %c0_1 = arith.constant 0 : index
    %c0_2 = arith.constant 0 : index
    %1 = vector.load %arg1[%c0_1, %c0_2] : memref<1x256xf32, #tpu.memory_space<vmem>>, vector<1x256xf32>
    %2 = vector.broadcast %1 : vector<1x256xf32> to vector<16x256xf32>
    %3 = arith.mulf %0, %2 : vector<16x256xf32>
    %c0_3 = arith.constant 0 : index
    %c0_4 = arith.constant 0 : index
    %4 = vector.load %arg3[%c0_3, %c0_4] : memref<16x256xf32, #tpu.memory_space<vmem>>, vector<16x256xf32>
    tpu.vector_store %arg3[%c0_3, %c0_4], %3 {strides = array<i32>} : memref<16x256xf32, #tpu.memory_space<vmem>>, vector<16x256xf32>,
    return
  }
  func.func @transform_0(%arg0: i32) -> (i32, i32) {
    %c0_i32 = arith.constant 0 : i32
    %c0_i32_0 = arith.constant 0 : i32
    %c0_i32_1 = arith.constant 0 : i32
    return %c0_i32, %c0_i32_0 : i32, i32
  }
  func.func @transform_1(%arg0: i32) -> (i32, i32) {
    %c0_i32 = arith.constant 0 : i32
    %c0_i32_0 = arith.constant 0 : i32
    return %arg0, %c0_i32 : i32, i32
  }
  func.func @transform_2(%arg0: i32) -> (i32, i32) {
    %c0_i32 = arith.constant 0 : i32
    %c0_i32_0 = arith.constant 0 : i32
    return %arg0, %c0_i32 : i32, i32
  }
}

</mosaic_0001>

<bundles_post_ra>
// kernel: tile.9
= control target key start
LH: loop header
LB: loop body
LE: loop exit
PB: predicated region body
PF: predicated region fallthrough
CT: control target
= control target key end

     0   :  { %s7_s6 = smov 3  ;;  %s14_s9 = smov 3  ;;  %vm4_vm0 = vcmask 261120   ;;  %vm11_vm1 = vcmask 1048320   ;;  %vm18_vm2 = vcmask 785920   ;;  %vm25_vm3 = vcmask 523520   ;;  %s76_s0 = inlined_call_operand.vmem [shape: f32[8,32], index: 0, kind: input, shape index: {}]   ;;  %s77_s1 = inlined_call_operand.vmem [shape: f32[1,256], index: 1, kind: output, shape index: {}]  }
   0x1   :  { %v38_v0 = vld [vmem:[%s76_s0 + $0x3] ss:$4 sm:%s7_s6]   ;;  %s45_s10 = smov 96   ;;  %s21_s11 = smov 3  ;;  %v39_v1 = vld [vmem:[%s76_s0 + $0x2] ss:$4 sm:%s14_s9]  }
   0x2   :  { %9 = vrot.lane.b32.xlu0 %v38_v0, %s45_s10  ;;  %v40_v2 = vld [vmem:[%s76_s0 + $0x1] ss:$4 sm:%s21_s11]   ;;  %s2_s16 = smov 3  ;;  %s46_s17 = smov 32  }
   0x3   :  { %23 = vrot.lane.b32.xlu1 %v40_v2, %s46_s17  ;;  %v3_v3 = vld [vmem:[%s76_s0] ss:$4 sm:%s2_s16]   ;;  %s47_s0 = smov 64  }
   0x4   :  { %5 = vst.msk [vmem:[#allocation0] ss:$8 sm:$0x3] %vm4_vm0, %v3_v3  }
   0x6   :  { %16 = vrot.lane.b32.xlu0 %v39_v1, %s47_s0 }
  0x74   :  { %v10_v4 = vpop.permute.xlu0 %9  }
  0x75   :  { %12 = vst.msk [vmem:[#allocation0] ss:$8 sm:$0x3] %vm11_vm1, %v10_v4   ;;  %v24_v5 = vpop.permute.xlu1 %23  }
  0x78   :  { %v17_v6 = vpop.permute.xlu0 %16  }
  0x79   :  { %19 = vst.msk [vmem:[#allocation0] ss:$8 sm:$0x3] %vm18_vm2, %v17_v6  }
  0x7a   :  { %26 = vst.msk [vmem:[#allocation0] ss:$8 sm:$0x3] %vm25_vm3, %v24_v5  }
  0x81   :  { %v30_v7 = vld [vmem:[#allocation0] sm:$0x1]  ;;  %v34_v8 = vld [vmem:[#allocation0 + $0x8] sm:$0x1] }
  0x82   :  { %32 = vst [vmem:[%s77_s1] sm:$0x1] %v30_v7  ;;  %41 = vst [vmem:[%s77_s1 + $0x1] sm:$0x1] %v34_v8 }

// kernel: tile.8
= control target key start
LH: loop header
LB: loop body
LE: loop exit
PB: predicated region body
PF: predicated region fallthrough
CT: control target
= control target key end

     0   :  { %s22_s0 = inlined_call_operand.vmem [shape: f32[32], index: 0, kind: input, shape index: {}]   ;;  %s23_s1 = inlined_call_operand.vmem [shape: f32[8,32], index: 1, kind: output, shape index: {}]  }
   0x1   :  { %v4_v0 = vld [vmem:[%s22_s0] ss:$0 sm:$0xff] }
   0x2   :  { %5 = vst [vmem:[%s23_s1] sm:$0xff] %v4_v0 }

// kernel: annealed_hash.1
= control target key start
LH: loop header
LB: loop body
LE: loop exit
PB: predicated region body
PF: predicated region fallthrough
CT: control target
= control target key end

     0   :  { %s280_s9 = smov 0   ;;  %s300_s0 = inlined_call_operand.vmem [shape: f32[1,256], index: 0, kind: input, shape index: {}]   ;;  %s301_s1 = inlined_call_operand.vmem [shape: f32[125,256], index: 1, kind: input, shape index: {}]   ;;  %s302_s2 = inlined_call_operand.vmem [shape: f32[125,256], index: 2, kind: output, shape index: {}]  }
   0x1 LB: > { %s234_s10 = sadd.s32 4294967295, %s263_s9   ;;  %p238_p0 = scmp.ge.s32.totalorder %s263_s9, 1  ;;  %s263_s9 = sphi %s280_s9, %s12_s9  }
   0x2   : > { %p114_p1 = scmp.lt.s32.totalorder %s263_s9, 9 }
   0x4   : > { %p115_p2 = pnand %p238_p0, %p114_p1 }
   0x5   : > { %s239_s11 = sshll.u32 (!%p115_p2), %s234_s10, 1  ;;  %v158_v0 = vlaneseq (!%p115_p2)  ;;  %v156_v2 = vld [vmem:[%s300_s0] sm:$0x3] (!%p115_p2) }
   0x6   : > { %118 = sbr.rel (%p115_p2) target bundleno = 21 (0x15), region = 28  ;;  %p139_p3 = scmp.lt.s32.totalorder (!%p115_p2), %s239_s11, 15 }
   0x7   : > { %v159_v1 = vshrl.u32 (!%p115_p2), %v158_v0, 7 }
   0x9   : > { %v160_v3 = vsub.s32 (!%p115_p2), 0, %v159_v1  ;;  %v164_v4 = vsub.s32 (!%p115_p2), 1, %v159_v1 }
   0xb   : > { %v161_v5 = vrot.slane (!%p115_p2), %v156_v2, %v160_v3  ;;  %v165_v6 = vrot.slane (!%p115_p2), %v156_v2, %v164_v4 }
   0xd   : > { %s304_s11 = smov (!%p139_p3, %s239_s11), 15 }
   0xe   : > { %s247_s14 = sshll.u32 %s304_s11, 4 }
   0xf   : > { %s143_s17 = scalar_lea.vmem %s301_s1, %s247_s14  ;;  %s150_s20 = scalar_lea.vmem %s302_s2, %s247_s14 }
  0x10   : > { %v152_v7 = vld [vmem:[%s143_s17] sm:$0xff]  ;;  %v153_v8 = vld [vmem:[%s143_s17 + $0x8] sm:$0xff]  ;;  %v154_v9 = vld [vmem:[%s143_s17 + $0x10] sm:$0xff] }
  0x11   : > { %v168_v10 = vmul.f32 %v161_v5, %v152_v7  ;;  %v169_v11 = vmul.f32 %v165_v6, %v153_v8  ;;  %v170_v12 = vmul.f32 %v161_v5, %v154_v9  ;;  %v155_v13 = vld [vmem:[%s143_s17 + $0x18] sm:$0xff] }
  0x12   : > { %v171_v14 = vmul.f32 %v165_v6, %v155_v13 }
  0x13   : > { %172 = vst [vmem:[%s150_s20] sm:$0xff] %v168_v10  ;;  %173 = vst [vmem:[%s150_s20 + $0x8] sm:$0xff] %v169_v11 }
  0x14   : > { %174 = vst [vmem:[%s150_s20 + $0x10] sm:$0xff] %v170_v12  ;;  %175 = vst [vmem:[%s150_s20 + $0x18] sm:$0xff] %v171_v14 }
  0x15 PF: > { %s12_s9 = sadd.s32 1, %s263_s9  }
  0x16   : > { %p9_p4 = scmp.ge.s32.totalorder %s12_s9, 10  }
  0x18   :  { %11 = sbr.rel (!%p9_p4) target bundleno = 1 (0x1), region = 58 }

</bundles_post_ra>
